<compile_context>
chip_gen: v6e
topology: v6e:2x2x1
jax: 0.10.0
libtpu: 0.0.40
codegen_flags: <defaults>
</compile_context>

<pallas_src>
import functools
import math

import jax
import jax.numpy as jnp
from jax.experimental import pallas as pl
from jax.experimental.pallas import tpu as pltpu

_LOG_10000 = math.log(10000.0)


def _pos_emb_kernel(pos_ref, out_ref, *, demb: int):
    # pos_ref: (TS, 1) f32; out_ref: (TS, demb) out_dtype (size-1 dim squeezed).
    half = demb // 2
    pos = pos_ref[...]                                             # (TS, 1)

    # inv_freq[k] = 10000 ** (-2k/demb) = exp(-2k/demb * ln(10000)), k in [0, half).
    # Recomputed per tile on the EUP (idle slot) -> no HBM input / DMA for it.
    k = jax.lax.broadcasted_iota(jnp.int32, (1, half), 1).astype(jnp.float32)
    inv_freq = jnp.exp(k * jnp.float32(-2.0 * _LOG_10000 / demb))  # (1, half)

    sinusoid = pos * inv_freq                                      # (TS, half) outer product
    out_ref[:, :half] = jnp.sin(sinusoid).astype(out_ref.dtype)
    out_ref[:, half:] = jnp.cos(sinusoid).astype(out_ref.dtype)


def _round_up(x: int, m: int) -> int:
    return ((x + m - 1) // m) * m


def positional_embedding(pos_seq: jax.Array, demb: int, *,
                         tile_s: int | None = None,
                         out_dtype=jnp.float32) -> jax.Array:
    """pos_seq: (S,) float -> (S, 1, demb) out_dtype (sinusoidal positional embedding)."""
    assert demb % 2 == 0, "demb must be even"
    S = pos_seq.shape[0]
    itemsize = jnp.dtype(out_dtype).itemsize
    # Sublane packing of the output dtype: 8 rows for 4B, 16 for 2B, 32 for 1B.
    row_mult = {4: 8, 2: 16, 1: 32}.get(itemsize, 8)

    if tile_s is None:
        # Per-row VMEM cost, double-buffered: output tile + lane-padded (TS,1) pos input.
        per_row = 2 * demb * itemsize + 2 * 128 * 4
        budget = 12 * 1024 * 1024          # fits v5e's 16 MiB scoped default and v7x's 64 MiB
        tile_s = budget // per_row
        tile_s = min(tile_s, 2048)         # big enough to amortize ~0.35 us/step overhead
        # Keep >= 2 grid tiles whenever S allows, so v7x's two TCs both get work.
        tile_s = min(tile_s, _round_up(pl.cdiv(S, 2), row_mult))
    # Round to sublane packing; never larger than (rounded-up) S.
    tile_s = max(row_mult, _round_up(tile_s, row_mult))
    tile_s = min(tile_s, _round_up(S, row_mult))

    num_tiles = pl.cdiv(S, tile_s)
    pos_2d = pos_seq.astype(jnp.float32).reshape(S, 1)

    # Writeback-dominated; advisory estimate so XLA can overlap neighbours.
    cost = pl.CostEstimate(
        flops=S * demb,                    # outer-product multiplies (+ iota scale)
        transcendentals=S * demb,          # sin + cos (+ tiny exp for inv_freq)
        bytes_accessed=S * demb * itemsize + S * 4,
    )

    # Explicit VMEM budget: 2x double-buffered output tile + 2x lane-padded pos
    # tile + slack (the scoped default differs per chip: 16 MiB v5e, 32 MiB v6e/v7x).
    vmem_limit = int(2 * tile_s * demb * itemsize
                     + 2 * tile_s * 128 * 4
                     + (4 << 20))
    vmem_limit = max(vmem_limit, 8 << 20)

    # NOTE: for arange-style pos_seq the (TS, 1) input could be generated
    # in-kernel from program_id*tile_s + iota (start/step via scalar prefetch),
    # dropping the only input DMA; kept general here to match the module API.
    return pl.pallas_call(
        functools.partial(_pos_emb_kernel, demb=demb),
        out_shape=jax.ShapeDtypeStruct((S, 1, demb), out_dtype),
        grid_spec=pltpu.PrefetchScalarGridSpec(
            num_scalar_prefetch=0,
            grid=(num_tiles,),
            in_specs=[
                pl.BlockSpec((tile_s, 1), lambda i: (i, 0)),
            ],
            # Middle size-1 dim is squeezed out of the kernel ref, so the HBM
            # result is already (S, 1, demb) -- no reshape / slice afterwards.
            out_specs=pl.BlockSpec((tile_s, None, demb), lambda i: (i, 0, 0)),
        ),
        compiler_params=pltpu.CompilerParams(
            dimension_semantics=("parallel",),   # independent row tiles -> 2 TCs on v7x
            vmem_limit_bytes=vmem_limit,
        ),
        cost_estimate=cost,
    )(pos_2d)


def _reference(pos_seq: jax.Array, demb: int) -> jax.Array:
    inv_freq = 1.0 / (10000.0 ** (jnp.arange(0.0, demb, 2.0, dtype=jnp.float32) / demb))
    sinusoid = jnp.outer(pos_seq.astype(jnp.float32), inv_freq)
    pos_emb = jnp.concatenate([jnp.sin(sinusoid), jnp.cos(sinusoid)], axis=-1)
    return pos_emb[:, None, :]


if __name__ == "__main__":
    demb = 32
    seq = 8

    key = jax.random.PRNGKey(0)
    # Typical usage feeds descending positions; add small random jitter to make
    # the test deterministic yet non-trivial.
    pos_seq = jnp.arange(seq - 1, -1, -1, dtype=jnp.float32) \
        + jax.random.uniform(key, (seq,), dtype=jnp.float32)

    out = jax.block_until_ready(positional_embedding(pos_seq, demb))
    ref = _reference(pos_seq, demb)
    assert out.shape == (seq, 1, demb), out.shape
    assert jnp.allclose(out, ref, atol=1e-5, rtol=1e-5), "mismatch vs reference"

    # Non-tile-aligned, multi-tile sequence length to exercise the ragged last
    # block (Pallas masks its writeback; no pad/trim in the wrapper).
    seq2 = 37
    pos_seq2 = jnp.arange(seq2 - 1, -1, -1, dtype=jnp.float32)
    out2 = jax.block_until_ready(positional_embedding(pos_seq2, demb, tile_s=16))
    ref2 = _reference(pos_seq2, demb)
    assert out2.shape == (seq2, 1, demb), out2.shape
    assert jnp.allclose(out2, ref2, atol=1e-5, rtol=1e-5), "mismatch vs reference (tiled)"

    print("KERNEL_OK")
</pallas_src>

<mosaic_0001>
module attributes {stable_mosaic.version = 11 : i64} {
  func.func @_pos_emb_kernel(%arg0: i32, %arg1: memref<8x1xf32, #tpu.memory_space<vmem>>, %arg2: memref<8x1x32xf32, #tpu.memory_space<vmem>>) attributes {dimension_semantics = [#tpu.dimension_semantics<parallel>], iteration_bounds = array<i64: 1>, scalar_prefetch = 0 : i64, scratch_operands = 0 : i64, tpu.core_type = #tpu.core_type<tc>, window_params = [{transform_indices = @transform_0, window_bounds = array<i64: 8, 1>}, {transform_indices = @transform_1, window_bounds = array<i64: 8, 1, 32>}]} {
    %c0 = arith.constant 0 : index
    %c0_0 = arith.constant 0 : index
    %0 = vector.load %arg1[%c0, %c0_0] : memref<8x1xf32, #tpu.memory_space<vmem>>, vector<8x1xf32>
    %1 = tpu.iota {dimensions = array<i32: 1>} : vector<1x16xi32>
    %2 = arith.sitofp %1 : vector<1x16xi32> to vector<1x16xf32>
    %cst = arith.constant -0.575646281 : f32
    %3 = vector.broadcast %cst : f32 to vector<1x16xf32>
    %4 = arith.mulf %2, %3 : vector<1x16xf32>
    %5 = math.exp %4 : vector<1x16xf32>
    %6 = vector.broadcast %0 : vector<8x1xf32> to vector<8x16xf32>
    %7 = vector.broadcast %5 : vector<1x16xf32> to vector<8x16xf32>
    %8 = arith.mulf %6, %7 : vector<8x16xf32>
    %9 = math.sin %8 : vector<8x16xf32>
    %c0_1 = arith.constant 0 : index
    %c0_2 = arith.constant 0 : index
    %c0_3 = arith.constant 0 : index
    %10 = vector.load %arg2[%c0_1, %c0_2, %c0_3] : memref<8x1x32xf32, #tpu.memory_space<vmem>>, vector<8x1x16xf32>
    %11 = vector.shape_cast %10 : vector<8x1x16xf32> to vector<8x16xf32>
    %12 = vector.shape_cast %9 : vector<8x16xf32> to vector<8x1x16xf32>
    tpu.vector_store %arg2[%c0_1, %c0_2, %c0_3], %12 {strides = array<i32>} : memref<8x1x32xf32, #tpu.memory_space<vmem>>, vector<8x1x16xf32>,
    %13 = math.cos %8 : vector<8x16xf32>
    %c0_4 = arith.constant 0 : index
    %c0_5 = arith.constant 0 : index
    %c16 = arith.constant 16 : index
    %14 = vector.load %arg2[%c0_4, %c0_5, %c16] : memref<8x1x32xf32, #tpu.memory_space<vmem>>, vector<8x1x16xf32>
    %15 = vector.shape_cast %14 : vector<8x1x16xf32> to vector<8x16xf32>
    %16 = vector.shape_cast %13 : vector<8x16xf32> to vector<8x1x16xf32>
    tpu.vector_store %arg2[%c0_4, %c0_5, %c16], %16 {strides = array<i32>} : memref<8x1x32xf32, #tpu.memory_space<vmem>>, vector<8x1x16xf32>,
    return
  }
  func.func @transform_0(%arg0: i32) -> (i32, i32) {
    %c0_i32 = arith.constant 0 : i32
    %c0_i32_0 = arith.constant 0 : i32
    return %arg0, %c0_i32 : i32, i32
  }
  func.func @transform_1(%arg0: i32) -> (i32, i32, i32) {
    %c0_i32 = arith.constant 0 : i32
    %c0_i32_0 = arith.constant 0 : i32
    %c0_i32_1 = arith.constant 0 : i32
    return %arg0, %c0_i32, %c0_i32_0 : i32, i32, i32
  }
}

</mosaic_0001>

<bundles_post_ra>
// kernel: tpu_custom_call.1
= control target key start
LH: loop header
LB: loop body
LE: loop exit
PB: predicated region body
PF: predicated region fallthrough
CT: control target
= control target key end

     0   :  { %v479_v1 = vmov 0   ;;  %s555_s0 = inlined_call_operand.vmem [shape: f32[8,1], index: 0, kind: input, shape index: {}]   ;;  %s556_s1 = inlined_call_operand.hbm [shape: f32[8,1,32], index: 1, kind: output, shape index: {}]  }
   0x1   :  { %v9_v0 = vld [vmem:[%s555_s0] sm:$0xff]  ;;  %450 = vset.pattern.permute.xlu0 %v479_v1 }
   0x2   :  { %18 = vperm.xlu0 %450, %v9_v0  }
   0x3   :  { %6 = vsyncpa [#allocation3], 0  ;;  %v10_v2 = vlaneseq  ;;  %v480_v20 = vmov 683565275   ;;  %v481_v22 = vmov 2475754826  }
   0x4   :  { %v482_v25 = vmov 2131351028   ;;  %v483_v28 = vmov 2102212464   ;;  %v484_v31 = vmov 920167782  }
   0x5   :  { %v11_v3 = vand.u32 127, %v10_v2  ;;  %v485_v34 = vmov 1326507024   ;;  %s487_s0 = smov 16   ;;  %s488_s8 = smov [#allocation2]  }
   0x6   :  { %s416_s9 = sshll.u32 %s488_s8, 4  ;;  %s417_s9 = int_to_ptr.vmem [resolvable:$true] %s416_s9 }
   0x7   :  { %v12_v4 = vcvt.s32.f32 %v11_v3  ;;  %s457_s10 = scalar_lea.vmem %s417_s9, 128  ;;  %p462_p1 = scmp.lt.s32.totalorder %s417_s9, %s417_s9 }
   0x8   :  { %p458_p0 = scmp.ne.s32.totalorder %s417_s9, %s457_s10  ;;  %p463_p2 = scmp.lt.s32.totalorder %s457_s10, %s457_s10 }
   0x9   :  { %v13_v5 = vmul.f32 -0.5756463, %v12_v4 }
   0xa   :  { %p464_p3 = por %p463_p2, %p462_p1 }
   0xb   :  { %v14_v6 = vmul.f32 1.442695, %v13_v5 }
   0xc   :  { %p465_p4 = pnand %p464_p3, %p458_p0 }
   0xd   :  { %451 = vpow2.f32 %v14_v6 }
  0x1a   :  { %v452_v7 = vpop.eup %451 }
  0x7d   :  { %v19_v8 = vpop.permute.xlu0 %18 }
  0x7e   :  { %v504_v9 = vmul.f32 %v452_v7, %v19_v8 }
  0x80   :  { %v25_v10 = vand.u32 2139095040, %v504_v9  ;;  %v22_v14 = vand.u32 2147483647, %v504_v9  ;;  %vm24_vm7 = vcmp.lt.s32.totalorder %v504_v9, 0  ;;  %vm114_vm15 = vweird.f32 %v504_v9 }
  0x82   :  { %v26_v11 = vshrl.u32 %v25_v10, 23  ;;  %v29_v17 = vand.u32 8388607, %v22_v14  ;;  %vm23_vm8 = vcmp.le.f32.partialorder %v22_v14, 0.7853982 }
  0x84   :  { %v427_v12 = vadd.s32 4294967169, %v26_v11  ;;  %v30_v36 = vor.u32 8388608, %v29_v17 }
  0x86   :  { %v32_v13 = vadd.s32 1, %v427_v12  ;;  %v70_v50 = vshll.u32 %v30_v36, 8 }
  0x88   :  { %vm33_vm0 = vcmp.gt.s32.totalorder %v32_v13, 0 }
  0x89   :  { %v34_v15 = vsel %vm33_vm0, %v32_v13, 0  ;;  %vm184_vm0 = vcmask 122880  }
  0x8a   :  { %v36_v16 = vand.u32 31, %v34_v15  ;;  %v35_v19 = vshrl.u32 %v34_v15, 5 }
  0x8c   :  { %v37_v18 = vsub.s32 32, %v36_v16  ;;  %v39_v21 = vshll.u32 %v480_v20, %v36_v16  ;;  %v42_v23 = vshll.u32 %v481_v22, %v36_v16  ;;  %v45_v27 = vshll.u32 %v482_v25, %v36_v16 }
  0x8d   :  { %v48_v30 = vshll.u32 %v483_v28, %v36_v16  ;;  %v51_v33 = vshll.u32 %v484_v31, %v36_v16  ;;  %vm54_vm1 = vcmp.lt.s32.totalorder %v35_v19, 1  ;;  %vm57_vm2 = vcmp.lt.s32.totalorder %v35_v19, 4 }
  0x8e   :  { %v40_v24 = vshrl.u32 %v481_v22, %v37_v18  ;;  %v43_v26 = vshrl.u32 %v482_v25, %v37_v18  ;;  %v46_v29 = vshrl.u32 %v483_v28, %v37_v18  ;;  %v49_v32 = vshrl.u32 %v484_v31, %v37_v18 }
  0x8f   :  { %v52_v35 = vshrl.u32 %v485_v34, %v37_v18  ;;  %v38_v45 = vshrl.u32 %v480_v20, %v37_v18  ;;  %vm56_vm3 = vcmp.lt.s32.totalorder %v35_v19, 3  ;;  %vm55_vm4 = vcmp.lt.s32.totalorder %v35_v19, 2 }
  0x90   :  { %v41_v37 = vor.u32 %v40_v24, %v39_v21  ;;  %v44_v38 = vor.u32 %v43_v26, %v42_v23  ;;  %v47_v39 = vor.u32 %v46_v29, %v45_v27  ;;  %v50_v40 = vor.u32 %v49_v32, %v48_v30 }
  0x91   :  { %v53_v41 = vor.u32 %v52_v35, %v51_v33  ;;  %v486_v30 = vmov 1966171168   ;;  %v132_v34 = vshrl.u32 %v10_v2, 7 }
  0x92   :  { %v59_v42 = vsel %vm57_vm2, %v47_v39, 2102212464  ;;  %v62_v43 = vsel %vm54_vm1, %v41_v37, %v44_v38  ;;  %v66_v44 = vsel %vm54_vm1, %v44_v38, %v47_v39  ;;  %v63_v46 = vsel %vm57_vm2, %v50_v40, 920167782 }
  0x93   :  { %v67_v47 = vsel %vm57_vm2, %v53_v41, 1326507024  ;;  %v64_v48 = vsel %vm56_vm3, %v47_v39, %v63_v46  ;;  %v58_v51 = vsel %vm54_vm1, %v38_v45, %v41_v37  ;;  %v60_v52 = vsel %vm56_vm3, %v44_v38, %v59_v42 }
  0x94   :  { %v68_v49 = vsel %vm56_vm3, %v50_v40, %v67_v47  ;;  %v65_v53 = vsel %vm55_vm4, %v62_v43, %v64_v48  ;;  %v61_v59 = vsel %vm55_vm4, %v58_v51, %v60_v52  ;;  %v129_v31 = vunpack.c.l.s4 %v486_v30 }
  0x95   :  { %v69_v54 = vsel %vm55_vm4, %v66_v44, %v68_v49  ;;  %v513_v57 = vmul.u32.u64.low %v70_v50, %v65_v53  ;;  %v514_v58 = vmul.u32.u64.high %v70_v50, %v65_v53, %v513_v57  ;;  %v77_v61 = vmul.u32 %v70_v50, %v61_v59 }
  0x96   :  { %v510_v55 = vmul.u32.u64.low %v70_v50, %v69_v54  ;;  %v511_v56 = vmul.u32.u64.high %v70_v50, %v69_v54, %v510_v55  ;;  %v130_v33 = vunpack.c.0.s8 %v129_v31  ;;  %v348_v46 = vsub.s32 0, %v132_v34 }
  0x97   :  { %v80_v60 = vadd.s32 1, %v514_v58  ;;  %vm402_vm1 = vcmask 254080  }
  0x98   :  { %vm79_vm5 = vc.u32 %v511_v56, %v513_v57  ;;  %v78_v11 = vadd.s32 %v513_v57, %v511_v56  ;;  %v133_v40 = vsub.s32 %v130_v33, %v132_v34 }
  0x99   :  { %v81_v62 = vsel %vm79_vm5, %v80_v60, %v514_v58 }
  0x9a   :  { %v82_v63 = vadd.s32 %v81_v62, %v77_v61 }
  0x9c   :  { %v83_v0 = vadd.s32 536870912, %v82_v63 }
  0x9e   :  { %v84_v1 = vshrl.u32 %v83_v0, 30 }
  0xa0   :  { %v85_v3 = vshll.u32 %v84_v1, 30  ;;  %v108_v25 = vsub.s32 4, %v84_v1 }
  0xa2   :  { %v86_v4 = vsub.s32 %v82_v63, %v85_v3  ;;  %v109_v28 = vsel %vm24_vm7, %v108_v25, %v84_v1 }
  0xa3   :  { %v111_v29 = vsel %vm23_vm8, 0, %v109_v28 }
  0xa4   :  { %v88_v5 = vsub.s32 0, %v86_v4  ;;  %v115_v32 = vadd.s32 3, %v111_v29  ;;  %v286_v35 = vand.u32 3, %v111_v29 }
  0xa6   :  { %v428_v6 = vmin.u32 %v88_v5, %v86_v4  ;;  %v116_v36 = vand.u32 3, %v115_v32  ;;  %vm291_vm9 = vcmp.eq.s32.totalorder %v286_v35, 2  ;;  %vm288_vm11 = vcmp.eq.s32.totalorder %v286_v35, 0 }
  0xa7   :  { %vm287_vm13 = vcmp.lt.s32.totalorder %v286_v35, 2 }
  0xa8   :  { %v90_v7 = vclz %v428_v6  ;;  %vm121_vm10 = vcmp.eq.s32.totalorder %v116_v36, 2  ;;  %vm118_vm12 = vcmp.eq.s32.totalorder %v116_v36, 0  ;;  %vm117_vm14 = vcmp.lt.s32.totalorder %v116_v36, 2 }
  0xaa   :  { %v429_v8 = vadd.s32 4294967294, %v90_v7 }
  0xac   :  { %vm430_vm6 = vcmp.lt.s32.totalorder %v429_v8, 0 }
  0xad   :  { %v93_v10 = vsel %vm430_vm6, 0, %v429_v8 }
  0xae   :  { %v94_v12 = vsub.s32 32, %v93_v10  ;;  %v98_v13 = vsub.s32 4294967266, %v93_v10  ;;  %v95_v15 = vshll.u32 %v86_v4, %v93_v10 }
  0xb0   :  { %v96_v16 = vshrl.u32 %v78_v11, %v94_v12  ;;  %v99_v17 = vadd.s32 127, %v98_v13 }
  0xb2   :  { %v97_v18 = vor.u32 %v96_v16, %v95_v15  ;;  %v100_v19 = vshll.u32 %v99_v17, 23 }
  0xb4   :  { %v101_v20 = vor.u32 4788187, %v100_v19  ;;  %v104_v22 = vcvt.s32.f32 %v97_v18 }
  0xb6   :  { %v102_v21 = vand.u32 2147483647, %v101_v20 }
  0xb8   :  { %v105_v23 = vmul.f32 %v104_v22, %v102_v21 }
  0xba   :  { %v106_v24 = vxor.u32 2147483648, %v105_v23 }
  0xbc   :  { %v107_v26 = vsel %vm24_vm7, %v106_v24, %v105_v23 }
  0xbd   :  { %v110_v27 = vsel %vm23_vm8, %v504_v9, %v107_v26 }
  0xbe   :  { %453 = vcosq.f32 %v110_v27 }
  0xbf   :  { %455 = vsinq.f32 %v110_v27 }
  0xcb   :  { %v454_v37 = vpop.eup %453 }
  0xcc   :  { %v456_v38 = vpop.eup %455  ;;  %v122_v39 = vxor.u32 2147483648, %v454_v37 }
  0xcd   :  { %v119_v14 = vxor.u32 2147483648, %v456_v38 }
  0xce   :  { %v293_v41 = vsel %vm291_vm9, %v122_v39, %v456_v38  ;;  %v123_v42 = vsel %vm121_vm10, %v122_v39, %v456_v38 }
  0xcf   :  { %v290_v43 = vsel %vm288_vm11, %v454_v37, %v119_v14  ;;  %v120_v44 = vsel %vm118_vm12, %v454_v37, %v119_v14 }
  0xd0   :  { %v294_v2 = vsel %vm287_vm13, %v290_v43, %v293_v41  ;;  %v124_v45 = vsel %vm117_vm14, %v120_v44, %v123_v42 }
  0xd1   :  { %v295_v47 = vsel %vm114_vm15, nan, %v294_v2  ;;  %v125_v48 = vsel %vm114_vm15, nan, %v124_v45 }
  0xd2   :  { %v304_v49 = vrot.slane %v295_v47, %v133_v40  ;;  %v297_v50 = vcombine.high %v295_v47, %v295_v47  ;;  %v127_v51 = vcombine.high %v125_v48, %v125_v48  ;;  %v134_v52 = vrot.slane %v125_v48, %v133_v40 }
  0xd4   :  { %v320_v53 = vrot.slane %v304_v49, %v133_v40  ;;  %v312_v54 = vcombine.high %v304_v49, %v304_v49  ;;  %v311_v55 = vrot.slane %v297_v50, %v133_v40  ;;  %v150_v56 = vrot.slane %v134_v52, %v133_v40 }
  0xd5   :  { %v142_v57 = vcombine.high %v134_v52, %v134_v52  ;;  %v141_v58 = vrot.slane %v127_v51, %v133_v40 }
  0xd6   :  { %v349_v59 = vrot.slane %v320_v53, %v348_v46  ;;  %v334_v60 = vrot.slane %v312_v54, %v133_v40  ;;  %v342_v61 = vcombine.high %v320_v53, %v320_v53  ;;  %v313_v9 = vcombine.high %v311_v55, %v311_v55  ;;  %185 = vst.msk [vmem:[#allocation2] sm:$0x1] %vm184_vm0, %v150_v56 }
  0xd7   :  { %v327_v62 = vrot.slane %v311_v55, %v133_v40  ;;  %v164_v63 = vrot.slane %v142_v57, %v133_v40  ;;  %v172_v0 = vcombine.high %v150_v56, %v150_v56  ;;  %v143_v1 = vcombine.high %v141_v58, %v141_v58 }
  0xd8   :  { %378 = vrot.lane.b32.xlu0 %v349_v59, %s487_s0  ;;  %v353_v3 = vrot.slane %v334_v60, %v348_v46  ;;  %v344_v4 = vcombine.high %v334_v60, %v334_v60  ;;  %v357_v5 = vrot.slane %v342_v61, %v348_v46  ;;  %v341_v6 = vrot.slane %v313_v9, %v133_v40 }
  0xd9   :  { %v365_v7 = vrot.slane %v327_v62, %v348_v46  ;;  %v343_v8 = vcombine.high %v327_v62, %v327_v62  ;;  %186 = vst.msk [vmem:[#allocation2 + $0x1] sm:$0x1] %vm184_vm0, %v164_v63  ;;  %v174_v10 = vcombine.high %v164_v63, %v164_v63  ;;  %187 = vst.msk [vmem:[#allocation2 + $0x2] sm:$0x1] %vm184_vm0, %v172_v0 }
  0xda   :  { %v171_v11 = vrot.slane %v143_v1, %v133_v40  ;;  %380 = vrot.lane.b32.xlu1 %v353_v3, %s487_s0  ;;  %v361_v12 = vrot.slane %v344_v4, %v348_v46  ;;  %v369_v13 = vrot.slane %v341_v6, %v348_v46  ;;  %v345_v15 = vcombine.high %v341_v6, %v341_v6 }
  0xdb   :  { %v157_v16 = vrot.slane %v141_v58, %v133_v40  ;;  %v373_v17 = vrot.slane %v343_v8, %v348_v46  ;;  %188 = vst.msk [vmem:[#allocation2 + $0x3] sm:$0x1] %vm184_vm0, %v174_v10 }
  0xdc   :  { %190 = vst.msk [vmem:[#allocation2 + $0x5] sm:$0x1] %vm184_vm0, %v171_v11  ;;  %v175_v18 = vcombine.high %v171_v11, %v171_v11  ;;  %384 = vrot.lane.b32.xlu0 %v361_v12, %s487_s0  ;;  %v377_v19 = vrot.slane %v345_v15, %v348_v46 }
  0xdd   :  { %189 = vst.msk [vmem:[#allocation2 + $0x4] sm:$0x1] %vm184_vm0, %v157_v16  ;;  %v173_v20 = vcombine.high %v157_v16, %v157_v16 }
  0xde   :  { %192 = vst.msk [vmem:[#allocation2 + $0x7] sm:$0x1] %vm184_vm0, %v175_v18  ;;  %382 = vrot.lane.b32.xlu1 %v357_v5, %s487_s0 }
  0xdf   :  { %191 = vst.msk [vmem:[#allocation2 + $0x6] sm:$0x1] %vm184_vm0, %v173_v20 }
  0xe0   :  { %388 = vrot.lane.b32.xlu0 %v369_v13, %s487_s0 }
  0xe2   :  { %386 = vrot.lane.b32.xlu1 %v365_v7, %s487_s0 }
  0xe4   :  { %392 = vrot.lane.b32.xlu0 %v377_v19, %s487_s0 }
  0xe6   :  { %390 = vrot.lane.b32.xlu1 %v373_v17, %s487_s0 }
 0x14a   :  { %v379_v21 = vpop.permute.xlu0 %378 }
 0x14b   :  { %403 = vst.msk [vmem:[#allocation2] sm:$0x1] %vm402_vm1, %v379_v21 }
 0x14c   :  { %v381_v22 = vpop.permute.xlu1 %380 }
 0x14d   :  { %404 = vst.msk [vmem:[#allocation2 + $0x1] sm:$0x1] %vm402_vm1, %v381_v22 }
 0x14e   :  { %v385_v23 = vpop.permute.xlu0 %384 }
 0x14f   :  { %406 = vst.msk [vmem:[#allocation2 + $0x3] sm:$0x1] %vm402_vm1, %v385_v23 }
 0x150   :  { %v383_v24 = vpop.permute.xlu1 %382 }
 0x151   :  { %405 = vst.msk [vmem:[#allocation2 + $0x2] sm:$0x1] %vm402_vm1, %v383_v24 }
 0x152   :  { %v389_v25 = vpop.permute.xlu0 %388 }
 0x153   :  { %408 = vst.msk [vmem:[#allocation2 + $0x5] sm:$0x1] %vm402_vm1, %v389_v25 }
 0x154   :  { %v387_v26 = vpop.permute.xlu1 %386 }
 0x155   :  { %407 = vst.msk [vmem:[#allocation2 + $0x4] sm:$0x1] %vm402_vm1, %v387_v26 }
 0x156   :  { %v393_v27 = vpop.permute.xlu0 %392 }
 0x157   :  { %410 = vst.msk [vmem:[#allocation2 + $0x7] sm:$0x1] %vm402_vm1, %v393_v27 }
 0x158   :  { %v391_v28 = vpop.permute.xlu1 %390 }
 0x159   :  { %409 = vst.msk [vmem:[#allocation2 + $0x6] sm:$0x1] %vm402_vm1, %v391_v28 }
 0x15a   :  { %468 = shalt.err (!%p465_p4)
}
 0x15b   :  { %s489_s11 = smov 1  }
 0x15c   :  { %422 = dma.vmem_to_hbm [thread:$0]  %s417_s9, 128, %s556_s1, [#allocation3], %s487_s0, %s487_s0, %s489_s11  }
 0x15d   :  { %477 = dma.done.wait [#allocation3], 128  }
 0x15e   :  { %478 = vsyncadd [#allocation3], 4294967168 }
 0x15f   :  { %426 = vsyncpa [#allocation3], 1 }

</bundles_post_ra>
